<compile_context>
chip_gen: v7x
topology: tpu7x:2x2x1
jax: 0.10.0
libtpu: 0.0.40
codegen_flags: <defaults>
</compile_context>

<pallas_src>
import functools

import jax
import jax.numpy as jnp
from jax.experimental import pallas as pl
from jax.experimental.pallas import tpu as pltpu

_LANE = 128
_MAX_TILE = 8192  # rows/step cap; beyond this the ~0.35us/step grid overhead is already amortized


def _round_up(x, m):
    return -(-x // m) * m


def _criterion_kernel(logits_ref, cos_ref, tgt_ref, out_ref, acc_ref, *,
                      protos_per_class, clst_coef, sep_coef, inv_batch,
                      valid_rows, rows_per_tile, mask_tail):
    """acc[b] += (lse_b - logit_b[t_b]) - clst*max_p cos[b,t_b,p] + sep*min_{c!=t_b,p} cos[b,c,p].

    The scalar collapse and the 1/B scaling run only on the final grid step."""
    step = pl.program_id(0)

    @pl.when(step == 0)
    def _init():
        acc_ref[...] = jnp.zeros_like(acc_ref)

    logits = logits_ref[...].astype(jnp.float32)   # (bt, C) — exp/log want f32
    cos = cos_ref[...]                             # (bt, C*P) native dtype (max/min are exact selects)
    tgt = tgt_ref[...]                             # (bt, 1) int32

    bt, c = logits.shape
    cp = cos.shape[-1]
    p = protos_per_class

    # ---- cross entropy per row (stable logsumexp), keepdims everywhere ----
    row_max = jnp.max(logits, axis=-1, keepdims=True)                        # (bt, 1)
    lse = row_max + jnp.log(jnp.sum(jnp.exp(logits - row_max),
                                    axis=-1, keepdims=True))                 # (bt, 1)
    cls_iota = jax.lax.broadcasted_iota(jnp.int32, (1, c), 1)                # (1, C)
    tgt_logit = jnp.sum(jnp.where(cls_iota == tgt, logits, 0.0),
                        axis=-1, keepdims=True)                              # (bt, 1)

    # ---- prototype-class membership: one subtract + one unsigned compare ----
    cp_iota = jax.lax.broadcasted_iota(jnp.int32, (1, cp), 1)                # (1, C*P)
    diff = cp_iota - tgt * p                                                 # (bt, C*P)
    pos_mask = pltpu.bitcast(diff, jnp.uint32) < jnp.uint32(p)               # diff in [0, P)

    minus_inf = jnp.asarray(-jnp.inf, cos.dtype)
    plus_inf = jnp.asarray(jnp.inf, cos.dtype)
    pos_max = jnp.max(jnp.where(pos_mask, cos, minus_inf),
                      axis=-1, keepdims=True).astype(jnp.float32)            # (bt, 1)
    neg_min = jnp.min(jnp.where(pos_mask, plus_inf, cos),
                      axis=-1, keepdims=True).astype(jnp.float32)            # (bt, 1)

    per_row = (lse - tgt_logit) - clst_coef * pos_max + sep_coef * neg_min   # (bt, 1)

    if mask_tail:  # zero out padded tail rows (B padded up to a tile multiple)
        row = jax.lax.broadcasted_iota(jnp.int32, (bt, 1), 0)
        per_row = jnp.where(step * rows_per_tile + row < valid_rows, per_row, 0.0)

    # Vector-only accumulation per step (no SMEM RMW, no per-step reduction).
    acc_ref[...] += per_row

    @pl.when(step == pl.num_programs(0) - 1)
    def _finalize():
        out_ref[0, 0] = inv_batch * jnp.sum(acc_ref[...])


def _plan(batch, c, cp, in_bytes, max_rows_per_tile=None):
    """Pick rows-per-tile from a generation-aware VMEM budget (double-buffered inputs)."""
    row_in = (_round_up(c, _LANE) + _round_up(cp, _LANE)) * in_bytes + _LANE * 4  # logits+cos+targets
    row_acc = _LANE * 4                                                            # (bt,1) f32 scratch
    try:
        vmem_cap = int(pltpu.get_tpu_info().vmem_capacity_bytes)  # 64 MiB v7x, 128 MiB v5e/v6e
    except Exception:
        vmem_cap = 64 << 20                                        # conservative default
    budget = max(vmem_cap // 2 - (4 << 20), 8 << 20)               # double-buffered working-set cap
    max_bt = min(max(int(budget // (2 * row_in + row_acc)), 8), _MAX_TILE)
    if max_rows_per_tile is not None:
        max_bt = min(max_bt, int(max_rows_per_tile))
    if batch <= max_bt:
        bt, padded = batch, batch                  # single full block (always layout-legal)
    else:
        bt = max((max_bt // 8) * 8, 8)             # sublane-aligned tile
        padded = _round_up(batch, bt)
    needed = 2 * bt * row_in + bt * row_acc + (8 << 20)
    vmem_limit = int(min(int(vmem_cap * 0.9), max(needed, 32 << 20)))
    return bt, padded, vmem_limit


def criterion(logits, cosine_logits, targets, *, num_classes, clst_coef, sep_coef,
              max_rows_per_tile=None):
    B, C = logits.shape
    assert C == num_classes
    CP = cosine_logits.shape[1]
    assert CP % num_classes == 0
    assert cosine_logits.shape[0] == B and targets.shape == (B,)
    P = CP // num_classes

    in_bytes = jnp.dtype(logits.dtype).itemsize
    bt, padded_B, vmem_limit = _plan(B, C, CP, in_bytes, max_rows_per_tile)

    tgt2d = targets.reshape(B, 1).astype(jnp.int32)
    if padded_B != B:
        pad = padded_B - B
        logits = jnp.pad(logits, ((0, pad), (0, 0)))
        cosine_logits = jnp.pad(cosine_logits, ((0, pad), (0, 0)))
        tgt2d = jnp.pad(tgt2d, ((0, pad), (0, 0)))

    grid = (padded_B // bt,)

    kern = functools.partial(
        _criterion_kernel,
        protos_per_class=P,
        clst_coef=float(clst_coef),
        sep_coef=float(sep_coef),
        inv_batch=1.0 / float(B),
        valid_rows=B,
        rows_per_tile=bt,
        mask_tail=(padded_B != B))

    bytes_accessed = padded_B * ((_round_up(C, _LANE) + _round_up(CP, _LANE)) * in_bytes
                                 + _LANE * 4) + 4
    cost = pl.CostEstimate(flops=int(padded_B * (6 * CP + 12 * C)),
                           transcendentals=int(padded_B * (C + 1)),
                           bytes_accessed=int(bytes_accessed))

    out = pl.pallas_call(
        kern,
        out_shape=jax.ShapeDtypeStruct((1, 1), jnp.float32),
        grid=grid,
        in_specs=[pl.BlockSpec((bt, C), lambda i: (i, 0)),
                  pl.BlockSpec((bt, CP), lambda i: (i, 0)),
                  pl.BlockSpec((bt, 1), lambda i: (i, 0))],
        out_specs=pl.BlockSpec((1, 1), lambda i: (0, 0),
                               memory_space=pltpu.MemorySpace.SMEM),
        scratch_shapes=[pltpu.VMEM((bt, 1), jnp.float32)],
        compiler_params=pltpu.CompilerParams(
            dimension_semantics=("arbitrary",),      # grid axis is a reduction
            vmem_limit_bytes=vmem_limit),
        cost_estimate=cost,
    )(logits, cosine_logits, tgt2d)
    return out[0, 0]


def _criterion_ref(logits, cosine_logits, targets, *, num_classes, clst_coef, sep_coef):
    """Pure-JAX reference mirroring the torch forward pass."""
    B, _ = logits.shape
    P = cosine_logits.shape[1] // num_classes
    logits = logits.astype(jnp.float32)
    cosine_logits = cosine_logits.astype(jnp.float32)
    ce = jnp.mean(jax.nn.logsumexp(logits, axis=-1)
                  - jnp.take_along_axis(logits, targets[:, None], axis=1)[:, 0])
    cos3 = cosine_logits.reshape(B, num_classes, P)
    pos = jnp.take_along_axis(cos3, targets[:, None, None], axis=1)[:, 0, :]   # (B, P)
    clst = jnp.mean(jnp.min(-pos, axis=-1))
    onehot = jax.nn.one_hot(targets, num_classes, dtype=jnp.bool_)             # (B, C)
    masked = jnp.where(onehot[:, :, None], jnp.inf, cos3)
    sep = jnp.mean(jnp.min(masked, axis=(1, 2)))
    return ce + clst_coef * clst + sep_coef * sep


if __name__ == "__main__":
    NUM_CLASSES = 16
    PROTOS_PER_CLASS = 3          # matches the implied (...,-1,3) reshape in torch
    CLST_COEF = 0.8
    SEP_COEF = 0.08

    key = jax.random.PRNGKey(0)

    # --- config 1: small batch, single-tile path ---
    B = 8
    k1, k2, k3, key = jax.random.split(key, 4)
    logits = jax.random.normal(k1, (B, NUM_CLASSES), dtype=jnp.float32)
    cos = jax.random.uniform(k2, (B, NUM_CLASSES * PROTOS_PER_CLASS),
                             dtype=jnp.float32, minval=-1.0, maxval=1.0)
    tgt = jax.random.randint(k3, (B,), 0, NUM_CLASSES, dtype=jnp.int32)
    loss = jax.block_until_ready(criterion(logits, cos, tgt, num_classes=NUM_CLASSES,
                                           clst_coef=CLST_COEF, sep_coef=SEP_COEF))
    ref = _criterion_ref(logits, cos, tgt, num_classes=NUM_CLASSES,
                         clst_coef=CLST_COEF, sep_coef=SEP_COEF)
    assert jnp.allclose(loss, ref, rtol=1e-5, atol=1e-5), (loss, ref)

    # --- config 2: batch not a multiple of the tile -> padded, multi-step reduction grid ---
    B = 300
    k1, k2, k3, key = jax.random.split(key, 4)
    logits = jax.random.normal(k1, (B, NUM_CLASSES), dtype=jnp.float32)
    cos = jax.random.uniform(k2, (B, NUM_CLASSES * PROTOS_PER_CLASS),
                             dtype=jnp.float32, minval=-1.0, maxval=1.0)
    tgt = jax.random.randint(k3, (B,), 0, NUM_CLASSES, dtype=jnp.int32)
    loss = jax.block_until_ready(criterion(logits, cos, tgt, num_classes=NUM_CLASSES,
                                           clst_coef=CLST_COEF, sep_coef=SEP_COEF,
                                           max_rows_per_tile=128))
    ref = _criterion_ref(logits, cos, tgt, num_classes=NUM_CLASSES,
                         clst_coef=CLST_COEF, sep_coef=SEP_COEF)
    assert jnp.allclose(loss, ref, rtol=1e-5, atol=1e-5), (loss, ref)

    print("KERNEL_OK")
</pallas_src>

<mosaic_0001>
module attributes {stable_mosaic.version = 11 : i64} {
  func.func @_criterion_kernel(%arg0: i32, %arg1: memref<8x16xf32, #tpu.memory_space<vmem>>, %arg2: memref<8x48xf32, #tpu.memory_space<vmem>>, %arg3: memref<8x1xi32, #tpu.memory_space<vmem>>, %arg4: memref<1x1xf32, #tpu.memory_space<smem>>, %arg5: memref<8x1xf32, #tpu.memory_space<vmem>>) attributes {dimension_semantics = [#tpu.dimension_semantics<arbitrary>], iteration_bounds = array<i64: 1>, scalar_prefetch = 0 : i64, scratch_operands = 1 : i64, tpu.core_type = #tpu.core_type<tc>, window_params = [{transform_indices = @transform_0, window_bounds = array<i64: 8, 16>}, {transform_indices = @transform_1, window_bounds = array<i64: 8, 48>}, {transform_indices = @transform_2, window_bounds = array<i64: 8, 1>}, {transform_indices = @transform_3, window_bounds = array<i64: 1, 1>}]} {
    %c0_i32 = arith.constant 0 : i32
    %0 = arith.cmpi eq, %arg0, %c0_i32 : i32
    %1 = arith.extui %0 : i1 to i32
    %c0_i32_0 = arith.constant 0 : i32
    %2 = arith.cmpi ne, %1, %c0_i32_0 : i32
    scf.if %2 {
      %cst_22 = arith.constant 0.000000e+00 : f32
      %53 = vector.broadcast %cst_22 : f32 to vector<8x1xf32>
      %c0_23 = arith.constant 0 : index
      %c0_24 = arith.constant 0 : index
      %54 = vector.load %arg5[%c0_23, %c0_24] : memref<8x1xf32, #tpu.memory_space<vmem>>, vector<8x1xf32>
      tpu.vector_store %arg5[%c0_23, %c0_24], %53 {strides = array<i32>} : memref<8x1xf32, #tpu.memory_space<vmem>>, vector<8x1xf32>,
    } else {
    }
    %c0 = arith.constant 0 : index
    %c0_1 = arith.constant 0 : index
    %3 = vector.load %arg1[%c0, %c0_1] : memref<8x16xf32, #tpu.memory_space<vmem>>, vector<8x16xf32>
    %c0_2 = arith.constant 0 : index
    %c0_3 = arith.constant 0 : index
    %4 = vector.load %arg2[%c0_2, %c0_3] : memref<8x48xf32, #tpu.memory_space<vmem>>, vector<8x48xf32>
    %c0_4 = arith.constant 0 : index
    %c0_5 = arith.constant 0 : index
    %5 = vector.load %arg3[%c0_4, %c0_5] : memref<8x1xi32, #tpu.memory_space<vmem>>, vector<8x1xi32>
    %cst = arith.constant dense<0xFF800000> : vector<8xf32>
    %6 = vector.multi_reduction <maximumf>, %3, %cst [1] : vector<8x16xf32> to vector<8xf32>
    %7 = vector.shape_cast %6 : vector<8xf32> to vector<8x1xf32>
    %8 = vector.broadcast %7 : vector<8x1xf32> to vector<8x16xf32>
    %9 = arith.subf %3, %8 : vector<8x16xf32>
    %10 = math.exp %9 : vector<8x16xf32>
    %cst_6 = arith.constant dense<0.000000e+00> : vector<8xf32>
    %11 = vector.multi_reduction <add>, %10, %cst_6 [1] : vector<8x16xf32> to vector<8xf32>
    %12 = vector.shape_cast %11 : vector<8xf32> to vector<8x1xf32>
    %13 = math.log %12 : vector<8x1xf32>
    %14 = arith.addf %7, %13 : vector<8x1xf32>
    %15 = tpu.iota {dimensions = array<i32: 1>} : vector<1x16xi32>
    %16 = vector.broadcast %15 : vector<1x16xi32> to vector<8x16xi32>
    %17 = vector.broadcast %5 : vector<8x1xi32> to vector<8x16xi32>
    %18 = arith.cmpi eq, %16, %17 : vector<8x16xi32>
    %cst_7 = arith.constant 0.000000e+00 : f32
    %19 = vector.broadcast %cst_7 : f32 to vector<8x16xf32>
    %20 = arith.select %18, %3, %19 : vector<8x16xi1>, vector<8x16xf32>
    %cst_8 = arith.constant dense<0.000000e+00> : vector<8xf32>
    %21 = vector.multi_reduction <add>, %20, %cst_8 [1] : vector<8x16xf32> to vector<8xf32>
    %22 = vector.shape_cast %21 : vector<8xf32> to vector<8x1xf32>
    %23 = tpu.iota {dimensions = array<i32: 1>} : vector<1x48xi32>
    %c3_i32 = arith.constant 3 : i32
    %24 = vector.broadcast %c3_i32 : i32 to vector<8x1xi32>
    %25 = arith.muli %5, %24 : vector<8x1xi32>
    %26 = vector.broadcast %23 : vector<1x48xi32> to vector<8x48xi32>
    %27 = vector.broadcast %25 : vector<8x1xi32> to vector<8x48xi32>
    %28 = arith.subi %26, %27 : vector<8x48xi32>
    %29 = tpu.bitcast %28 : vector<8x48xi32> -> vector<8x48xi32>
    %c3_i32_9 = arith.constant 3 : i32
    %30 = vector.broadcast %c3_i32_9 : i32 to vector<8x48xi32>
    %31 = arith.cmpi ult, %29, %30 : vector<8x48xi32>
    %cst_10 = arith.constant 0xFF800000 : f32
    %32 = vector.broadcast %cst_10 : f32 to vector<8x48xf32>
    %33 = arith.select %31, %4, %32 : vector<8x48xi1>, vector<8x48xf32>
    %cst_11 = arith.constant dense<0xFF800000> : vector<8xf32>
    %34 = vector.multi_reduction <maximumf>, %33, %cst_11 [1] : vector<8x48xf32> to vector<8xf32>
    %35 = vector.shape_cast %34 : vector<8xf32> to vector<8x1xf32>
    %cst_12 = arith.constant 0x7F800000 : f32
    %36 = vector.broadcast %cst_12 : f32 to vector<8x48xf32>
    %37 = arith.select %31, %36, %4 : vector<8x48xi1>, vector<8x48xf32>
    %cst_13 = arith.constant dense<0x7F800000> : vector<8xf32>
    %38 = vector.multi_reduction <minimumf>, %37, %cst_13 [1] : vector<8x48xf32> to vector<8xf32>
    %39 = vector.shape_cast %38 : vector<8xf32> to vector<8x1xf32>
    %40 = arith.subf %14, %22 : vector<8x1xf32>
    %cst_14 = arith.constant 8.000000e-01 : f32
    %41 = vector.broadcast %cst_14 : f32 to vector<8x1xf32>
    %42 = arith.mulf %41, %35 : vector<8x1xf32>
    %43 = arith.subf %40, %42 : vector<8x1xf32>
    %cst_15 = arith.constant 8.000000e-02 : f32
    %44 = vector.broadcast %cst_15 : f32 to vector<8x1xf32>
    %45 = arith.mulf %44, %39 : vector<8x1xf32>
    %46 = arith.addf %43, %45 : vector<8x1xf32>
    %c0_16 = arith.constant 0 : index
    %c0_17 = arith.constant 0 : index
    %47 = vector.load %arg5[%c0_16, %c0_17] : memref<8x1xf32, #tpu.memory_space<vmem>>, vector<8x1xf32>
    %48 = arith.addf %47, %46 : vector<8x1xf32>
    %c0_18 = arith.constant 0 : index
    %c0_19 = arith.constant 0 : index
    %49 = vector.load %arg5[%c0_18, %c0_19] : memref<8x1xf32, #tpu.memory_space<vmem>>, vector<8x1xf32>
    tpu.vector_store %arg5[%c0_18, %c0_19], %48 {strides = array<i32>} : memref<8x1xf32, #tpu.memory_space<vmem>>, vector<8x1xf32>,
    %c0_i32_20 = arith.constant 0 : i32
    %50 = arith.cmpi eq, %arg0, %c0_i32_20 : i32
    %51 = arith.extui %50 : i1 to i32
    %c0_i32_21 = arith.constant 0 : i32
    %52 = arith.cmpi ne, %51, %c0_i32_21 : i32
    scf.if %52 {
      %c0_22 = arith.constant 0 : index
      %c0_23 = arith.constant 0 : index
      %53 = vector.load %arg5[%c0_22, %c0_23] : memref<8x1xf32, #tpu.memory_space<vmem>>, vector<8x1xf32>
      %54 = vector.shape_cast %53 : vector<8x1xf32> to vector<1x8x1xf32>
      %cst_24 = arith.constant dense<0.000000e+00> : vector<1xf32>
      %55 = vector.multi_reduction <add>, %54, %cst_24 [1, 2] : vector<1x8x1xf32> to vector<1xf32>
      %56 = vector.shape_cast %55 : vector<1xf32> to vector<1x1x1xf32>
      %57 = vector.extract %56[0, 0, 0] : f32 from vector<1x1x1xf32>
      %cst_25 = arith.constant 1.250000e-01 : f32
      %58 = arith.mulf %cst_25, %57 : f32
      %c0_26 = arith.constant 0 : index
      %c0_27 = arith.constant 0 : index
      %59 = memref.load %arg4[%c0_26, %c0_27] : memref<1x1xf32, #tpu.memory_space<smem>>
      memref.store %58, %arg4[%c0_26, %c0_27] : memref<1x1xf32, #tpu.memory_space<smem>>
    } else {
    }
    return
  }
  func.func @transform_0(%arg0: i32) -> (i32, i32) {
    %c0_i32 = arith.constant 0 : i32
    %c0_i32_0 = arith.constant 0 : i32
    return %arg0, %c0_i32 : i32, i32
  }
  func.func @transform_1(%arg0: i32) -> (i32, i32) {
    %c0_i32 = arith.constant 0 : i32
    %c0_i32_0 = arith.constant 0 : i32
    return %arg0, %c0_i32 : i32, i32
  }
  func.func @transform_2(%arg0: i32) -> (i32, i32) {
    %c0_i32 = arith.constant 0 : i32
    %c0_i32_0 = arith.constant 0 : i32
    return %arg0, %c0_i32 : i32, i32
  }
  func.func @transform_3(%arg0: i32) -> (i32, i32) {
    %c0_i32 = arith.constant 0 : i32
    %c0_i32_0 = arith.constant 0 : i32
    %c0_i32_1 = arith.constant 0 : i32
    return %c0_i32, %c0_i32_0 : i32, i32
  }
}

</mosaic_0001>

<bundles_post_ra>
// kernel: tpu_custom_call.1
= control target key start
LH: loop header
LB: loop body
LE: loop exit
PB: predicated region body
PF: predicated region fallthrough
CT: control target
= control target key end

     0   :  { %8 = vsyncpa [#allocation4], 0  ;;  %s222_s0 = inlined_call_operand.vmem [shape: f32[8,16], index: 0, kind: input, shape index: {}]   ;;  %s223_s1 = inlined_call_operand.hbm [shape: f32[8,48], index: 1, kind: input, shape index: {}]   ;;  %s224_s2 = inlined_call_operand.vmem [shape: s32[8,1], index: 2, kind: input, shape index: {}]   ;;  %s225_s3 = inlined_call_operand.hbm [shape: f32[1,1], index: 3, kind: output, shape index: {}]  }
   0x1   :  { %9 = vsyncpa [#allocation5], 0  ;;  %s162_s12 = smov [#allocation3]   ;;  %s126_s16 = scalar_lea.hbm %s223_s1, 128 }
   0x2   :  { %s18_s13 = sshll.u32 %s162_s12, 4  ;;  %p127_p0 = scmp.ne.s32.totalorder %s223_s1, %s126_s16  ;;  %s19_s13 = int_to_ptr.vmem [resolvable:$true] %s18_s13 }
   0x3   :  { %p130_p1 = scmp.lt.u32.totalorder %s126_s16, %s223_s1 }
   0x5   :  { %p132_p2 = pnand %p130_p1, %p127_p0 }
   0x7   :  { %135 = shalt.err (!%p132_p2)
}
   0x8   :  { %s136_s21 = scalar_lea.vmem %s19_s13, 128  ;;  %p141_p4 = scmp.lt.s32.totalorder %s19_s13, %s19_s13 }
   0x9   :  { %p137_p3 = scmp.ne.s32.totalorder %s19_s13, %s136_s21  ;;  %p142_p5 = scmp.lt.s32.totalorder %s136_s21, %s136_s21 }
   0xb   :  { %p143_p6 = por %p142_p5, %p141_p4 }
   0xd   :  { %p144_p7 = pnand %p143_p6, %p137_p3 }
   0xf   :  { %147 = shalt.err (!%p144_p7)
}
  0x10   :  { %21 = dma.hbm_to_vmem [thread:$0]  %s223_s1, 128, %s19_s13, [#allocation4]  }
  0x11   :  { %158 = dma.done.wait [#allocation4], 128  }
  0x12   :  { %159 = vsyncadd [#allocation4], 4294967168  ;;  %v163_v0 = vmov 0   ;;  %vm36_vm0 = vcmask 130048   ;;  %v33_v1 = vld [vmem:[%s222_s0] sm:$0xff]  ;;  %v49_v8 = vlaneseq  ;;  %v34_v13 = vld [vmem:[#allocation3] sm:$0xff] }
  0x13   :  { %121 = vset.pattern.permute.xlu1 %v163_v0  ;;  %120 = vset.pattern.permute.xlu0 %v163_v0  ;;  %v35_v2 = vld [vmem:[%s224_s2] sm:$0xff]  ;;  %v37_v3 = vsel %vm36_vm0, %v33_v1, -inf  ;;  %vm66_vm1 = vcmask 392192   ;;  %vm31_vm4 = vcmask 7168   ;;  %v164_v22 = vmov 0.0   ;;  %s148_s29 = scalar_lea.hbm %s225_s3, 16 }
  0x14   :  { %52 = vperm.xlu1 %121, %v35_v2   ;;  %38 = vmax.xlane.f32.xlu0 %v37_v3  ;;  %v59_v4 = vmul.u32 3, %v35_v2  ;;  %v50_v9 = vand.u32 127, %v49_v8  ;;  %32 = vst.msk [vmem:[#allocation2] sm:$0xff] %vm31_vm4, %v164_v22  ;;  %p149_p8 = scmp.ne.s32.totalorder %s225_s3, %s148_s29  ;;  %p152_p9 = scmp.lt.u32.totalorder %s148_s29, %s225_s3 }
  0x16   :  { %p154_p10 = pnand %p152_p9, %p149_p8 }
  0x1b   :  { %v79_v34 = vld [vmem:[#allocation2] sm:$0xff] }
  0x2a   :  { %61 = vperm.xlu0 %120, %v59_v4  }
  0x93   :  { %v53_v11 = vpop.permute.xlu1 %52 }
  0x94   :  { %vm54_vm3 = vcmp.eq.s32.totalorder %v50_v9, %v53_v11 }
  0x95   :  { %v55_v17 = vsel %vm54_vm3, %v33_v1, 0.0 }
  0x96   :  { %v56_v19 = vsel %vm36_vm0, %v55_v17, 0.0 }
  0xa1   :  { %v39_v5 = vpop.xlane.xlu0 %38 }
  0xa2   :  { %v40_v6 = vsub.f32 %v33_v1, %v39_v5 }
  0xa4   :  { %v41_v7 = vmul.f32 1.442695, %v40_v6 }
  0xa6   :  { %122 = vpow2.f32 %v41_v7 }
  0xa9   :  { %v62_v10 = vpop.permute.xlu0 %61 }
  0xaa   :  { %v63_v12 = vsub.s32 %v50_v9, %v62_v10 }
  0xac   :  { %vm64_vm2 = vcmp.lt.u32.totalorder %v63_v12, 3 }
  0xad   :  { %v70_v14 = vsel %vm64_vm2, inf, %v34_v13  ;;  %v65_v20 = vsel %vm64_vm2, %v34_v13, -inf }
  0xae   :  { %v71_v15 = vsel %vm66_vm1, %v70_v14, inf  ;;  %v67_v21 = vsel %vm66_vm1, %v65_v20, -inf }
  0xaf   :  { %72 = vmin.xlane.f32.xlu0 %v71_v15 }
  0xb0   :  { %v123_v16 = vpop.eup %122 }
  0xb1   :  { %v43_v18 = vsel %vm36_vm0, %v123_v16, 0.0 }
  0xb2   :  { %44 = vadd.xlane.f32.xlu1 %v43_v18 }
  0xb6   :  { %57 = vadd.xlane.f32.xlu1 %v56_v19 }
  0xba   :  { %68 = vmax.xlane.f32.xlu1 %v67_v21 }
 0x13c   :  { %v73_v30 = vpop.xlane.xlu0 %72 }
 0x13d   :  { %v77_v32 = vmul.f32 0.08, %v73_v30 }
 0x13f   :  { %v45_v23 = vpop.xlane.xlu1 %44 }
 0x140   :  { %124 = vlog2.f32 %v45_v23 }
 0x143   :  { %v58_v24 = vpop.xlane.xlu1 %57 }
 0x147   :  { %v69_v26 = vpop.xlane.xlu1 %68 }
 0x148   :  { %v75_v29 = vmul.f32 0.8, %v69_v26 }
 0x14a   :  { %v125_v25 = vpop.eup %124 }
 0x14b   :  { %v47_v27 = vmul.f32 0.6931472, %v125_v25 }
 0x14d   :  { %v48_v28 = vadd.f32 %v47_v27, %v39_v5 }
 0x14f   :  { %v74_v31 = vsub.f32 %v48_v28, %v58_v24 }
 0x151   :  { %v76_v33 = vsub.f32 %v74_v31, %v75_v29 }
 0x153   :  { %v78_v35 = vadd.f32 %v77_v32, %v76_v33 }
 0x155   :  { %v80_v36 = vadd.f32 %v79_v34, %v78_v35 }
 0x157   :  { %82 = vst.msk [vmem:[#allocation2] sm:$0xff] %vm31_vm4, %v80_v36 }
 0x15e   :  { %v86_v37 = vld [vmem:[#allocation2] sm:$0xff] }
 0x15f   :  { %v87_v38 = vsel %vm31_vm4, %v86_v37, 0.0 }
 0x160   :  { %88 = vadd.xlane.f32.xlu1 %v87_v38 }
 0x1ed   :  { %v89_v39 = vpop.xlane.xlu1 %88 }
 0x1ee   :  { %v90_v40 = vrot.slane %v89_v39, 4 }
 0x1f0   :  { %v91_v41 = vadd.f32 %v90_v40, %v89_v39 }
 0x1f2   :  { %v92_v42 = vrot.slane %v91_v41, 2 }
 0x1f4   :  { %v93_v43 = vadd.f32 %v92_v42, %v91_v41 }
 0x1f6   :  { %v94_v44 = vrot.slane %v93_v43, 1 }
 0x1f8   :  { %v95_v45 = vadd.f32 %v94_v44, %v93_v43 }
 0x1fa   :  { %114 = vpush %v95_v45 }
 0x22b   :  { %s115_s0 = spop %114 }
 0x22c   :  { %s97_s1 = smul.f32 0.125, %s115_s0 }
 0x22e   :  { %99 = sst [smem:[#allocation6]] %s97_s1 }
 0x22f   :  { %157 = shalt.err (!%p154_p10)
}
 0x230   :  { %s165_s7 = smov [#allocation6]  }
 0x231   :  { %107 = dma.smem_to_hbm %s165_s7, 16, %s225_s3, [#allocation5]  }
 0x232   :  { %160 = dma.done.wait [#allocation5], 16  }
 0x233   :  { %161 = vsyncadd [#allocation5], 4294967280 }
 0x234   :  { %111 = sfence }
 0x235   :  { %112 = vsyncpa [#allocation4], 1 }
 0x236   :  { %113 = vsyncpa [#allocation5], 1 }

</bundles_post_ra>
